<compile_context>
chip_gen: v7x
topology: tpu7x:2x2x1
jax: 0.10.0
libtpu: 0.0.40
codegen_flags: <defaults>
</compile_context>

<pallas_src>
import jax
import jax.numpy as jnp
from jax.experimental import pallas as pl
from jax.experimental.pallas import tpu as pltpu

KSIZE = 7
PAD = 3
CCH = 32  # channel-chunk size (multiple of 8) for the streaming pooling path


def _attention_kernel(x_ref, w1_ref, w2_ref, cm_ref, o_ref, ch_ref):
    # x_ref:  (C, HW)       lane-dense activations for one batch element
    # w1_ref: (C//r, C)     fc1 (1x1 conv) weight
    # w2_ref: (C, C//r)     fc2 (1x1 conv) weight
    # cm_ref: (2*HW, HW)    7x7 conv folded into a dense matrix (avg rows | max rows)
    # o_ref:  (C, HW)       output
    # ch_ref: (C, 1)        VMEM scratch for the channel gate (streaming path only)
    C, HW = x_ref.shape
    streaming = (C % CCH == 0) and (C // CCH > 1)  # static Python condition

    # ---------------- Channel attention ----------------
    if streaming:
        xin = None
        avg = jnp.mean(x_ref[...], axis=1, keepdims=True)          # (C, 1)
        mx = jnp.max(x_ref[...], axis=1, keepdims=True)            # (C, 1)
    else:
        xin = x_ref[...]                                           # load once, keep live
        avg = jnp.mean(xin, axis=1, keepdims=True)
        mx = jnp.max(xin, axis=1, keepdims=True)
    pooled = jnp.concatenate([avg, mx], axis=1)                    # (C, 2)  fused avg|max

    hid = jnp.maximum(
        jnp.dot(w1_ref[...], pooled, preferred_element_type=jnp.float32), 0.0)
    y = jnp.dot(w2_ref[...], hid, preferred_element_type=jnp.float32)   # (C, 2)
    ch = jax.nn.sigmoid(y[:, 0:1] + y[:, 1:2])                     # (C, 1) channel gate

    # ------- Spatial pooling of the channel-gated input (mean & max over C) -------
    if streaming:
        # Stream channel chunks; per-chunk work is pure VALU add/max on
        # (CCH, HW) accumulators, cross-sublane reduce happens once at the end.
        ch_ref[...] = ch
        nck = C // CCH

        def body(k, carry):
            s_acc, m_acc = carry
            start = pl.multiple_of(k * CCH, CCH)
            prod = x_ref[pl.ds(start, CCH), :] * ch_ref[pl.ds(start, CCH), :]
            return s_acc + prod, jnp.maximum(m_acc, prod)

        s_acc, m_acc = jax.lax.fori_loop(
            0, nck, body,
            (jnp.zeros((CCH, HW), jnp.float32),
             jnp.full((CCH, HW), -jnp.inf, jnp.float32)),
            unroll=True)
        sum_sp = jnp.sum(s_acc, axis=0, keepdims=True)             # (1, HW) one XLU reduce
        max_sp = jnp.max(m_acc, axis=0, keepdims=True)             # (1, HW)
    else:
        x1 = xin * ch                                              # (C, HW)
        sum_sp = jnp.sum(x1, axis=0, keepdims=True)
        max_sp = jnp.max(x1, axis=0, keepdims=True)
    avg_sp = sum_sp * (1.0 / C)                                    # (1, HW)

    # -------- Spatial attention: whole 7x7 conv as a single MXU matmul --------
    pooled_sp = jnp.concatenate([avg_sp, max_sp], axis=1)          # (1, 2*HW)
    conv = jnp.dot(pooled_sp, cm_ref[...], preferred_element_type=jnp.float32)
    sp = jax.nn.sigmoid(conv)                                      # (1, HW) spatial gate

    # -------- Final output: spatial gate * ORIGINAL x (as in the module) --------
    if streaming:
        o_ref[...] = x_ref[...] * sp   # re-read via ref: caps vreg pressure for big slabs
    else:
        o_ref[...] = xin * sp


def _conv_matrix(wsp, H, W):
    """Fold the 2-input-channel 7x7 cross-correlation (zero padding 3) into a
    dense (2*H*W, H*W) matrix M so that out[p*W+q] = [avg|max].flatten() @ M."""
    di = jnp.arange(H)[:, None] - jnp.arange(H)[None, :] + PAD     # (H, H): i - p + PAD
    dj = jnp.arange(W)[:, None] - jnp.arange(W)[None, :] + PAD     # (W, W): j - q + PAD
    vi = (di >= 0) & (di < KSIZE)
    vj = (dj >= 0) & (dj < KSIZE)
    dic = jnp.clip(di, 0, KSIZE - 1)
    djc = jnp.clip(dj, 0, KSIZE - 1)
    # taps[c, i, p, j, q] = wsp[c, i-p+PAD, j-q+PAD] inside the 7x7 window, else 0
    taps = wsp[:, dic[:, :, None, None], djc[None, None, :, :]]    # (2, H, H, W, W)
    mask = vi[:, :, None, None] & vj[None, None, :, :]             # (H, H, W, W)
    taps = jnp.where(mask[None], taps, 0.0)
    # rows indexed by (c, i, j), columns by (p, q)
    return taps.transpose(0, 1, 3, 2, 4).reshape(2 * H * W, H * W).astype(jnp.float32)


@jax.jit
def attention_module(x, w1, w2, wsp):
    """x: (B, C, H, W) f32; w1: (C//r, C); w2: (C, C//r); wsp: (2, 7, 7)."""
    B, C, H, W = x.shape
    C2 = w1.shape[0]
    HW = H * W

    # Lane-dense view of the activations (free layout plumbing under jit).
    # For non-demo shapes, keep H*W a multiple of 128 (pad in the wrapper) so the
    # output store stays unmasked; HW = 256 here already is.
    x2d = x.reshape(B, C, HW).astype(jnp.float32)

    # NOTE: for H*W much larger than ~1024 the dense conv matrix grows as HW^2;
    # switch back to a banded per-row-offset form there.
    cm = _conv_matrix(wsp.astype(jnp.float32), H, W)               # (2*HW, HW)

    # VMEM budget: double-buffered in/out slabs + weights/conv matrix + margin,
    # capped at 3/4 of the chip's physical VMEM (leaves headroom on v7x).
    slab = C * HW * 4
    fixed = (C2 * C + C * C2 + 2 * HW * HW + C) * 4
    need = 4 * slab + 2 * fixed + (8 << 20)
    try:
        cap = int(pltpu.get_tpu_info().vmem_capacity_bytes)
    except Exception:
        cap = 128 << 20
    vmem_limit = int(min(max(need, 32 << 20), (cap * 3) // 4))

    out2d = pl.pallas_call(
        _attention_kernel,
        out_shape=jax.ShapeDtypeStruct((B, C, HW), jnp.float32),
        grid=(B,),
        in_specs=[
            pl.BlockSpec((None, C, HW), lambda b: (b, 0, 0)),      # x, squeezed batch dim
            pl.BlockSpec((C2, C), lambda b: (0, 0)),               # fc1 weight
            pl.BlockSpec((C, C2), lambda b: (0, 0)),               # fc2 weight
            pl.BlockSpec((2 * HW, HW), lambda b: (0, 0)),          # folded 7x7 conv matrix
        ],
        out_specs=pl.BlockSpec((None, C, HW), lambda b: (b, 0, 0)),
        scratch_shapes=[pltpu.VMEM((C, 1), jnp.float32)],          # channel-gate scratch
        compiler_params=pltpu.CompilerParams(
            dimension_semantics=("parallel",),
            vmem_limit_bytes=vmem_limit),
    )(x2d, w1.astype(jnp.float32), w2.astype(jnp.float32), cm)

    return out2d.reshape(B, C, H, W).astype(x.dtype)


def reference(x, w1, w2, wsp):
    """Pure-JAX reference mirroring the PyTorch forward."""
    avg = jnp.mean(x, axis=(2, 3))  # (B, C)
    mx = jnp.max(x, axis=(2, 3))    # (B, C)

    def mlp(v):
        h = jnp.maximum(v @ w1.T, 0.0)
        return h @ w2.T

    ch = jax.nn.sigmoid(mlp(avg) + mlp(mx))            # (B, C)
    x1 = x * ch[:, :, None, None]
    avg_sp = jnp.mean(x1, axis=1, keepdims=True)       # (B, 1, H, W)
    max_sp = jnp.max(x1, axis=1, keepdims=True)        # (B, 1, H, W)
    sp_in = jnp.concatenate([avg_sp, max_sp], axis=1)  # (B, 2, H, W)
    conv = jax.lax.conv_general_dilated(
        sp_in, wsp.reshape(1, 2, KSIZE, KSIZE), (1, 1),
        padding=((PAD, PAD), (PAD, PAD)),
        dimension_numbers=("NCHW", "OIHW", "NCHW"),
        precision=jax.lax.Precision.HIGHEST)
    sp = jax.nn.sigmoid(conv)                          # (B, 1, H, W)
    return sp * x


if __name__ == "__main__":
    B, C, H, W = 2, 4, 16, 16
    ratio = 2
    C2 = C // ratio

    key = jax.random.PRNGKey(0)
    kx, k1, k2, k3 = jax.random.split(key, 4)

    x = jax.random.normal(kx, (B, C, H, W), dtype=jnp.float32)
    # Deterministic synthetic parameters (shapes from the module's __init__).
    fc1_w = jax.random.normal(k1, (C2, C), dtype=jnp.float32) * 0.5     # Conv2d(C, C//2, 1)
    fc2_w = jax.random.normal(k2, (C, C2), dtype=jnp.float32) * 0.5     # Conv2d(C//2, C, 1)
    sp_w = jax.random.normal(k3, (2, KSIZE, KSIZE), dtype=jnp.float32) * 0.1  # Conv2d(2,1,7)

    out = attention_module(x, fc1_w, fc2_w, sp_w)
    out = jax.block_until_ready(out)

    ref = reference(x, fc1_w, fc2_w, sp_w)
    assert out.shape == (B, C, H, W)
    err = jnp.max(jnp.abs(out - ref))
    # Tolerance accounts for MXU matmul rounding vs. the XLA conv reference.
    assert jnp.allclose(out, ref, atol=2e-3, rtol=2e-3), f"max abs err {err}"
    print("KERNEL_OK")
</pallas_src>

<mosaic_0001>
module attributes {stable_mosaic.version = 11 : i64} {
  func.func @_attention_kernel(%arg0: i32, %arg1: memref<1x4x256xf32, #tpu.memory_space<vmem>>, %arg2: memref<2x4xf32, #tpu.memory_space<vmem>>, %arg3: memref<4x2xf32, #tpu.memory_space<vmem>>, %arg4: memref<512x256xf32, #tpu.memory_space<vmem>>, %arg5: memref<1x4x256xf32, #tpu.memory_space<vmem>>, %arg6: memref<4x1xf32, #tpu.memory_space<vmem>>) attributes {dimension_semantics = [#tpu.dimension_semantics<parallel>], iteration_bounds = array<i64: 2>, scalar_prefetch = 0 : i64, scratch_operands = 1 : i64, tpu.core_type = #tpu.core_type<tc>, window_params = [{transform_indices = @transform_0, window_bounds = array<i64: 1, 4, 256>}, {pipeline_mode = #tpu.pipeline_mode<synchronous>, transform_indices = @transform_1, window_bounds = array<i64: 2, 4>}, {pipeline_mode = #tpu.pipeline_mode<synchronous>, transform_indices = @transform_2, window_bounds = array<i64: 4, 2>}, {pipeline_mode = #tpu.pipeline_mode<synchronous>, transform_indices = @transform_3, window_bounds = array<i64: 512, 256>}, {transform_indices = @transform_4, window_bounds = array<i64: 1, 4, 256>}]} {
    %c0 = arith.constant 0 : index
    %c0_0 = arith.constant 0 : index
    %c0_1 = arith.constant 0 : index
    %0 = vector.load %arg1[%c0, %c0_0, %c0_1] : memref<1x4x256xf32, #tpu.memory_space<vmem>>, vector<1x4x256xf32>
    %1 = vector.shape_cast %0 : vector<1x4x256xf32> to vector<4x256xf32>
    %cst = arith.constant dense<0.000000e+00> : vector<4xf32>
    %2 = vector.multi_reduction <add>, %1, %cst [1] : vector<4x256xf32> to vector<4xf32>
    %3 = vector.shape_cast %2 : vector<4xf32> to vector<4x1xf32>
    %cst_2 = arith.constant 2.560000e+02 : f32
    %4 = vector.broadcast %cst_2 : f32 to vector<4x1xf32>
    %5 = arith.divf %3, %4 : vector<4x1xf32>
    %cst_3 = arith.constant dense<0xFF800000> : vector<4xf32>
    %6 = vector.multi_reduction <maximumf>, %1, %cst_3 [1] : vector<4x256xf32> to vector<4xf32>
    %7 = vector.shape_cast %6 : vector<4xf32> to vector<4x1xf32>
    %8 = tpu.concatenate %5, %7 in 1 : vector<4x1xf32>, vector<4x1xf32> -> vector<4x2xf32>
    %c0_4 = arith.constant 0 : index
    %c0_5 = arith.constant 0 : index
    %9 = vector.load %arg2[%c0_4, %c0_5] : memref<2x4xf32, #tpu.memory_space<vmem>>, vector<2x4xf32>
    %cst_6 = arith.constant dense<0.000000e+00> : vector<2x2xf32>
    %10 = tpu.matmul %9, %8, %cst_6 {dimension_numbers = #tpu.dot_dimension_numbers<[1], [0], [0], [1], [0, 0, 1, 1], [], []>} : vector<2x4xf32>, vector<4x2xf32>, vector<2x2xf32> -> vector<2x2xf32>
    %cst_7 = arith.constant 0.000000e+00 : f32
    %11 = vector.broadcast %cst_7 : f32 to vector<2x2xf32>
    %12 = arith.maximumf %10, %11 : vector<2x2xf32>
    %c0_8 = arith.constant 0 : index
    %c0_9 = arith.constant 0 : index
    %13 = vector.load %arg3[%c0_8, %c0_9] : memref<4x2xf32, #tpu.memory_space<vmem>>, vector<4x2xf32>
    %cst_10 = arith.constant dense<0.000000e+00> : vector<4x2xf32>
    %14 = tpu.matmul %13, %12, %cst_10 {dimension_numbers = #tpu.dot_dimension_numbers<[1], [0], [0], [1], [0, 0, 1, 1], [], []>} : vector<4x2xf32>, vector<2x2xf32>, vector<4x2xf32> -> vector<4x2xf32>
    %15 = vector.extract_strided_slice %14 {offsets = [0, 0], sizes = [4, 1], strides = [1, 1]} : vector<4x2xf32> to vector<4x1xf32>
    %16 = vector.extract_strided_slice %14 {offsets = [0, 1], sizes = [4, 1], strides = [1, 1]} : vector<4x2xf32> to vector<4x1xf32>
    %17 = arith.addf %15, %16 : vector<4x1xf32>
    %18 = arith.negf %17 : vector<4x1xf32>
    %19 = math.exp %18 : vector<4x1xf32>
    %cst_11 = arith.constant 1.000000e+00 : f32
    %20 = vector.broadcast %cst_11 : f32 to vector<4x1xf32>
    %21 = arith.addf %20, %19 : vector<4x1xf32>
    %22 = arith.divf %20, %21 : vector<4x1xf32>
    %23 = vector.broadcast %22 : vector<4x1xf32> to vector<4x256xf32>
    %24 = arith.mulf %1, %23 : vector<4x256xf32>
    %cst_12 = arith.constant dense<0.000000e+00> : vector<256xf32>
    %25 = vector.multi_reduction <add>, %24, %cst_12 [0] : vector<4x256xf32> to vector<256xf32>
    %26 = vector.shape_cast %25 : vector<256xf32> to vector<1x256xf32>
    %cst_13 = arith.constant dense<0xFF800000> : vector<256xf32>
    %27 = vector.multi_reduction <maximumf>, %24, %cst_13 [0] : vector<4x256xf32> to vector<256xf32>
    %28 = vector.shape_cast %27 : vector<256xf32> to vector<1x256xf32>
    %cst_14 = arith.constant 2.500000e-01 : f32
    %29 = vector.broadcast %cst_14 : f32 to vector<1x256xf32>
    %30 = arith.mulf %26, %29 : vector<1x256xf32>
    %31 = tpu.concatenate %30, %28 in 1 : vector<1x256xf32>, vector<1x256xf32> -> vector<1x512xf32>
    %c0_15 = arith.constant 0 : index
    %c0_16 = arith.constant 0 : index
    %32 = vector.load %arg4[%c0_15, %c0_16] : memref<512x256xf32, #tpu.memory_space<vmem>>, vector<512x256xf32>
    %cst_17 = arith.constant dense<0.000000e+00> : vector<1x256xf32>
    %33 = tpu.matmul %31, %32, %cst_17 {dimension_numbers = #tpu.dot_dimension_numbers<[1], [0], [0], [1], [0, 0, 1, 1], [], []>} : vector<1x512xf32>, vector<512x256xf32>, vector<1x256xf32> -> vector<1x256xf32>
    %34 = arith.negf %33 : vector<1x256xf32>
    %35 = math.exp %34 : vector<1x256xf32>
    %cst_18 = arith.constant 1.000000e+00 : f32
    %36 = vector.broadcast %cst_18 : f32 to vector<1x256xf32>
    %37 = arith.addf %36, %35 : vector<1x256xf32>
    %38 = arith.divf %36, %37 : vector<1x256xf32>
    %39 = vector.broadcast %38 : vector<1x256xf32> to vector<4x256xf32>
    %40 = arith.mulf %1, %39 : vector<4x256xf32>
    %c0_19 = arith.constant 0 : index
    %c0_20 = arith.constant 0 : index
    %c0_21 = arith.constant 0 : index
    %41 = vector.load %arg5[%c0_19, %c0_20, %c0_21] : memref<1x4x256xf32, #tpu.memory_space<vmem>>, vector<1x4x256xf32>
    %42 = vector.shape_cast %41 : vector<1x4x256xf32> to vector<4x256xf32>
    %43 = vector.shape_cast %40 : vector<4x256xf32> to vector<1x4x256xf32>
    tpu.vector_store %arg5[%c0_19, %c0_20, %c0_21], %43 {strides = array<i32>} : memref<1x4x256xf32, #tpu.memory_space<vmem>>, vector<1x4x256xf32>,
    return
  }
  func.func @transform_0(%arg0: i32) -> (i32, i32, i32) {
    %c0_i32 = arith.constant 0 : i32
    %c0_i32_0 = arith.constant 0 : i32
    %c0_i32_1 = arith.constant 0 : i32
    return %arg0, %c0_i32, %c0_i32_0 : i32, i32, i32
  }
  func.func @transform_1(%arg0: i32) -> (i32, i32) {
    %c0_i32 = arith.constant 0 : i32
    %c0_i32_0 = arith.constant 0 : i32
    %c0_i32_1 = arith.constant 0 : i32
    return %c0_i32, %c0_i32_0 : i32, i32
  }
  func.func @transform_2(%arg0: i32) -> (i32, i32) {
    %c0_i32 = arith.constant 0 : i32
    %c0_i32_0 = arith.constant 0 : i32
    %c0_i32_1 = arith.constant 0 : i32
    return %c0_i32, %c0_i32_0 : i32, i32
  }
  func.func @transform_3(%arg0: i32) -> (i32, i32) {
    %c0_i32 = arith.constant 0 : i32
    %c0_i32_0 = arith.constant 0 : i32
    %c0_i32_1 = arith.constant 0 : i32
    return %c0_i32, %c0_i32_0 : i32, i32
  }
  func.func @transform_4(%arg0: i32) -> (i32, i32, i32) {
    %c0_i32 = arith.constant 0 : i32
    %c0_i32_0 = arith.constant 0 : i32
    %c0_i32_1 = arith.constant 0 : i32
    return %arg0, %c0_i32, %c0_i32_0 : i32, i32, i32
  }
}

</mosaic_0001>

<bundles_post_ra>
// kernel: attention_module.1
= control target key start
LH: loop header
LB: loop body
LE: loop exit
PB: predicated region body
PF: predicated region fallthrough
CT: control target
= control target key end

     0   :  { %s1013_s15 = smov 0   ;;  %s1448_s0 = inlined_call_operand.vmem [shape: f32[2,4,256], index: 0, kind: input, shape index: {}]   ;;  %s1449_s1 = inlined_call_operand.vmem [shape: f32[2,4], index: 1, kind: input, shape index: {}]   ;;  %s1450_s2 = inlined_call_operand.vmem [shape: f32[4,2], index: 2, kind: input, shape index: {}]   ;;  %s1451_s3 = inlined_call_operand.vmem [shape: f32[512,256], index: 3, kind: input, shape index: {}]   ;;  %s1452_s4 = inlined_call_operand.vmem [shape: f32[2,4,256], index: 4, kind: output, shape index: {}]  }
   0x1 LB: > { %s783_s16 = sadd.s32 4294967295, %s981_s15   ;;  %p787_p0 = scmp.ge.s32.totalorder %s981_s15, 1  ;;  %s981_s15 = sphi %s1013_s15, %s14_s15  }
   0x2   : > { %p162_p1 = scmp.lt.s32.totalorder %s981_s15, 3 }
   0x4   : > { %p163_p2 = pnand %p787_p0, %p162_p1 }
   0x5   : > { %p188_p3 = scmp.lt.s32.totalorder (!%p163_p2), %s783_s16, 1  ;;  %vm202_vm0 = vcmask (!%p163_p2), 1043456   ;;  %v983_v8 = vmov (!%p163_p2), 0.0   ;;  %vm984_vm1 = vmmov (!%p163_p2), 0   ;;  %vm215_vm2 = vcmask (!%p163_p2), 7168   ;;  %s985_s25 = smov (!%p163_p2), 127  }
   0x6   : > { %166 = sbr.rel (%p163_p2) target bundleno = 1138 (0x472), region = 36  ;;  %807 = vmatprep.subr.mxu0 (!%p163_p2), %v983_v8  ;;  %812 = vmatprep.subr.mxu1 (!%p163_p2), %v983_v8  ;;  %v217_v12 = vld [vmem:[%s1449_s1] sm:$0x3] (!%p163_p2)  ;;  %vm218_vm3 = vcmask (!%p163_p2), 31744   ;;  %vm301_vm4 = vcmask (!%p163_p2), 1041408   ;;  %vm297_vm5 = vcmask (!%p163_p2), 15360  }
   0x7   : > { %809 = vmatprep.mubr.msk.f32.mxu0 (!%p163_p2), %vm984_vm1, %v983_v8  ;;  %814 = vmatprep.mubr.msk.f32.mxu1 (!%p163_p2), %vm984_vm1, %v983_v8  ;;  %v296_v17 = vld [vmem:[%s1450_s2] sm:$0xf] (!%p163_p2)  ;;  %v986_v20 = vmov (!%p163_p2), 0   ;;  %v497_v21 = vld [vmem:[%s1451_s3 + $0x208] sm:$0xff] (!%p163_p2)  ;;  %v499_v22 = vld [vmem:[%s1451_s3 + $0x218] sm:$0xff] (!%p163_p2) }
   0x8   : > { %960 = vset.pattern.permute.xlu1 (!%p163_p2), %v986_v20  ;;  %961 = vset.pattern.permute.xlu0 (!%p163_p2), %v986_v20  ;;  %v496_v23 = vld [vmem:[%s1451_s3 + $0x200] sm:$0xff] (!%p163_p2)  ;;  %v881_v24 = vpack.c.bf16 (!%p163_p2), %v499_v22, %v497_v21  ;;  %v498_v25 = vld [vmem:[%s1451_s3 + $0x210] sm:$0xff] (!%p163_p2)  ;;  %v433_v26 = vld [vmem:[%s1451_s3 + $0x8] sm:$0xff] (!%p163_p2) }
   0x9   : > { %v435_v27 = vld [vmem:[%s1451_s3 + $0x18] sm:$0xff] (!%p163_p2)  ;;  %v883_v28 = vpack.c.bf16 (!%p163_p2), %v498_v25, %v496_v23  ;;  %v432_v30 = vld [vmem:[%s1451_s3] sm:$0xff] (!%p163_p2)  ;;  %v434_v31 = vld [vmem:[%s1451_s3 + $0x10] sm:$0xff] (!%p163_p2) }
   0xa   : > { %v817_v29 = vpack.c.bf16 (!%p163_p2), %v435_v27, %v433_v26  ;;  %v501_v32 = vld [vmem:[%s1451_s3 + $0x228] sm:$0xff] (!%p163_p2)  ;;  %v819_v33 = vpack.c.bf16 (!%p163_p2), %v434_v31, %v432_v30  ;;  %v503_v34 = vld [vmem:[%s1451_s3 + $0x238] sm:$0xff] (!%p163_p2)  ;;  %v500_v35 = vld [vmem:[%s1451_s3 + $0x220] sm:$0xff] (!%p163_p2) }
   0xb   : > { %v502_v36 = vld [vmem:[%s1451_s3 + $0x230] sm:$0xff] (!%p163_p2)  ;;  %v885_v37 = vpack.c.bf16 (!%p163_p2), %v503_v34, %v501_v32  ;;  %v437_v39 = vld [vmem:[%s1451_s3 + $0x28] sm:$0xff] (!%p163_p2)  ;;  %v439_v40 = vld [vmem:[%s1451_s3 + $0x38] sm:$0xff] (!%p163_p2) }
   0xc   : > { %v887_v38 = vpack.c.bf16 (!%p163_p2), %v502_v36, %v500_v35  ;;  %v436_v41 = vld [vmem:[%s1451_s3 + $0x20] sm:$0xff] (!%p163_p2)  ;;  %v821_v42 = vpack.c.bf16 (!%p163_p2), %v439_v40, %v437_v39  ;;  %v438_v43 = vld [vmem:[%s1451_s3 + $0x30] sm:$0xff] (!%p163_p2)  ;;  %v505_v44 = vld [vmem:[%s1451_s3 + $0x248] sm:$0xff] (!%p163_p2) }
   0xd   : > { %s1454_s16 = smov (!%p188_p3, %s783_s16), 1  ;;  %v507_v45 = vld [vmem:[%s1451_s3 + $0x258] sm:$0xff]  ;;  %v823_v46 = vpack.c.bf16 %v438_v43, %v436_v41  ;;  %v504_v48 = vld [vmem:[%s1451_s3 + $0x240] sm:$0xff]  ;;  %v506_v49 = vld [vmem:[%s1451_s3 + $0x250] sm:$0xff] }
   0xe   : > { %s801_s17 = sshll.u32 %s1454_s16, 3  ;;  %v889_v47 = vpack.c.bf16 %v507_v45, %v505_v44  ;;  %v441_v50 = vld [vmem:[%s1451_s3 + $0x48] sm:$0xff]  ;;  %v443_v51 = vld [vmem:[%s1451_s3 + $0x58] sm:$0xff]  ;;  %v440_v52 = vld [vmem:[%s1451_s3 + $0x40] sm:$0xff]  ;;  %v891_v54 = vpack.c.bf16 %v506_v49, %v504_v48 }
   0xf   : > { %s192_s20 = scalar_lea.vmem %s1448_s0, %s801_s17  ;;  %v442_v53 = vld [vmem:[%s1451_s3 + $0x50] sm:$0xff]  ;;  %v825_v55 = vpack.c.bf16 %v443_v51, %v441_v50  ;;  %v509_v56 = vld [vmem:[%s1451_s3 + $0x268] sm:$0xff]  ;;  %v511_v57 = vld [vmem:[%s1451_s3 + $0x278] sm:$0xff]  ;;  %s197_s5 = scalar_lea.vmem %s1452_s4, %s801_s17 }
  0x10   : > { %v1029_v0 = vld [vmem:[%s192_s20] sm:$0xff]  ;;  %v827_v59 = vpack.c.bf16 %v442_v53, %v440_v52  ;;  %v893_v60 = vpack.c.bf16 %v511_v57, %v509_v56  ;;  %v510_v61 = vld [vmem:[%s1451_s3 + $0x270] sm:$0xff]  ;;  %v445_v62 = vld [vmem:[%s1451_s3 + $0x68] sm:$0xff] }
  0x11   : > { %v200_v1 = vcombine.high %v1029_v0, %v1029_v0  ;;  %v203_v2 = vsel %vm202_vm0, %v1029_v0, 0.0  ;;  %v210_v4 = vsel %vm202_vm0, %v1029_v0, -inf  ;;  %v508_v58 = vld [vmem:[%s1451_s3 + $0x260] sm:$0xff]  ;;  %v447_v63 = vld [vmem:[%s1451_s3 + $0x78] sm:$0xff]  ;;  %v518_v25 = vld [vmem:[%s1451_s3 + $0x2b0] sm:$0xff] }
  0x12   : > { %v451_v8 = vld [vmem:[%s1451_s3 + $0x98] sm:$0xff]  ;;  %v452_v26 = vld [vmem:[%s1451_s3 + $0xa0] sm:$0xff]  ;;  %v457_v31 = vld [vmem:[%s1451_s3 + $0xc8] sm:$0xff] }
  0x13   : > { %v204_v3 = vsel %vm202_vm0, %v200_v1, 0.0  ;;  %v211_v5 = vsel %vm202_vm0, %v200_v1, -inf  ;;  %v829_v1 = vpack.c.bf16 %v447_v63, %v445_v62  ;;  %v455_v20 = vld [vmem:[%s1451_s3 + $0xb8] sm:$0xff]  ;;  %v520_v36 = vld [vmem:[%s1451_s3 + $0x2c0] sm:$0xff]  ;;  %v458_v40 = vld [vmem:[%s1451_s3 + $0xd0] sm:$0xff] }
  0x14   : > { %v205_v6 = vadd.f32 %v204_v3, %v203_v2  ;;  %v212_v7 = vmax.f32 %v210_v4, %v211_v5  ;;  %v444_v2 = vld [vmem:[%s1451_s3 + $0x60] sm:$0xff]  ;;  %v446_v3 = vld [vmem:[%s1451_s3 + $0x70] sm:$0xff]  ;;  %v513_v4 = vld [vmem:[%s1451_s3 + $0x288] sm:$0xff] }
  0x15   : > { %v515_v5 = vld [vmem:[%s1451_s3 + $0x298] sm:$0xff]  ;;  %v525_v41 = vld [vmem:[%s1451_s3 + $0x2e8] sm:$0xff]  ;;  %v524_v48 = vld [vmem:[%s1451_s3 + $0x2e0] sm:$0xff] }
  0x16   : > { %206 = vadd.xlane.f32.xlu0 %v205_v6  ;;  %v895_v6 = vpack.c.bf16 %v510_v61, %v508_v58  ;;  %v523_v30 = vld [vmem:[%s1451_s3 + $0x2d8] sm:$0xff]  ;;  %v461_v43 = vld [vmem:[%s1451_s3 + $0xe8] sm:$0xff]  ;;  %v526_v49 = vld [vmem:[%s1451_s3 + $0x2f0] sm:$0xff] }
  0x17   : > { %v459_v32 = vld [vmem:[%s1451_s3 + $0xd8] sm:$0xff]  ;;  %v460_v50 = vld [vmem:[%s1451_s3 + $0xe0] sm:$0xff]  ;;  %v462_v52 = vld [vmem:[%s1451_s3 + $0xf0] sm:$0xff]  ;;  %v911_v57 = vpack.c.bf16 %v526_v49, %v524_v48 }
  0x18   : > { %v841_v39 = vpack.c.bf16 %v459_v32, %v457_v31  ;;  %v463_v44 = vld [vmem:[%s1451_s3 + $0xf8] sm:$0xff]  ;;  %v529_v53 = vld [vmem:[%s1451_s3 + $0x308] sm:$0xff]  ;;  %v847_v58 = vpack.c.bf16 %v462_v52, %v460_v50  ;;  %v530_v61 = vld [vmem:[%s1451_s3 + $0x310] sm:$0xff] }
  0x19   : > { %v845_v51 = vpack.c.bf16 %v463_v44, %v461_v43  ;;  %v467_v56 = vld [vmem:[%s1451_s3 + $0x118] sm:$0xff]  ;;  %v464_v62 = vld [vmem:[%s1451_s3 + $0x100] sm:$0xff]  ;;  %v478_v44 = vld [vmem:[%s1451_s3 + $0x170] sm:$0xff] }
  0x1a   : > { %213 = vmax.xlane.f32.xlu0 %v212_v7  ;;  %v449_v7 = vld [vmem:[%s1451_s3 + $0x88] sm:$0xff]  ;;  %v476_v43 = vld [vmem:[%s1451_s3 + $0x160] sm:$0xff]  ;;  %v546_v50 = vld [vmem:[%s1451_s3 + $0x390] sm:$0xff] }
  0x1b   : > { %v544_v49 = vld [vmem:[%s1451_s3 + $0x380] sm:$0xff]  ;;  %v481_v52 = vld [vmem:[%s1451_s3 + $0x188] sm:$0xff] }
  0xa3   : > { %v207_v9 = vpop.xlane.xlu0 %206 }
  0xa4   : > { %v209_v10 = vmul.f32 0.00390625, %v207_v9  ;;  %v831_v9 = vpack.c.bf16 %v446_v3, %v444_v2  ;;  %v533_v2 = vld [vmem:[%s1451_s3 + $0x328] sm:$0xff]  ;;  %v535_v3 = vld [vmem:[%s1451_s3 + $0x338] sm:$0xff] }
  0xa7   : > { %v214_v11 = vpop.xlane.xlu0 %213 }
  0xa8   : > { %v216_v13 = vsel %vm215_vm2, %v209_v10, %v214_v11  ;;  %v897_v10 = vpack.c.bf16 %v515_v5, %v513_v4  ;;  %v512_v11 = vld [vmem:[%s1451_s3 + $0x280] sm:$0xff]  ;;  %v469_v4 = vld [vmem:[%s1451_s3 + $0x128] sm:$0xff]  ;;  %v471_v5 = vld [vmem:[%s1451_s3 + $0x138] sm:$0xff] }
  0xa9   : > { %808 = vmatpush3.msk.msra.mxu0 %vm202_vm0, %v216_v13  ;;  %v448_v13 = vld [vmem:[%s1451_s3 + $0x80] sm:$0xff] }
  0xaa   : > { %810 = vmatmul.mubr.msk.f32.vlgmr.msra.gmra.mrb[0].mxu0 %vm218_vm3, %v217_v12  ;;  %882 = vmatprep.subr.bf16.mxu0 %v881_v24  ;;  %v514_v12 = vld [vmem:[%s1451_s3 + $0x290] sm:$0xff]  ;;  %v516_v24 = vld [vmem:[%s1451_s3 + $0x2a0] sm:$0xff] }
  0xab   : > { %884 = vmatpush1.bf16.msra.mxu0 %v883_v28  ;;  %v899_v21 = vpack.c.bf16 %v514_v12, %v512_v11  ;;  %v454_v28 = vld [vmem:[%s1451_s3 + $0xb0] sm:$0xff]  ;;  %v468_v11 = vld [vmem:[%s1451_s3 + $0x120] sm:$0xff]  ;;  %v853_v12 = vpack.c.bf16 %v471_v5, %v469_v4 }
  0xac   : > { %886 = vmatprep.subr.bf16.mxu0 %v885_v37  ;;  %v839_v34 = vpack.c.bf16 %v454_v28, %v452_v26  ;;  %v522_v37 = vld [vmem:[%s1451_s3 + $0x2d0] sm:$0xff]  ;;  %v484_v4 = vld [vmem:[%s1451_s3 + $0x1a0] sm:$0xff] }
  0xad   : > { %v907_v45 = vpack.c.bf16 %v522_v37, %v520_v36  ;;  %v474_v26 = vld [vmem:[%s1451_s3 + $0x150] sm:$0xff]  ;;  %v540_v37 = vld [vmem:[%s1451_s3 + $0x360] sm:$0xff] }
  0xae   : > { %v486_v5 = vld [vmem:[%s1451_s3 + $0x1b0] sm:$0xff] }
  0xaf   : > { %888 = vmatpush1.bf16.msra.mxu0 %v887_v38  ;;  %v456_v38 = vld [vmem:[%s1451_s3 + $0xc0] sm:$0xff] }
  0xb0   : > { %890 = vmatprep.subr.bf16.mxu0 %v889_v47 }
  0xb3   : > { %892 = vmatpush1.bf16.msra.mxu0 %v891_v54  ;;  %v531_v54 = vld [vmem:[%s1451_s3 + $0x318] sm:$0xff] }
  0xb4   : > { %894 = vmatprep.subr.bf16.mxu0 %v893_v60  ;;  %v528_v60 = vld [vmem:[%s1451_s3 + $0x300] sm:$0xff] }
  0xb7   : > { %896 = vmatpush1.bf16.msra.mxu0 %v895_v6  ;;  %v915_v6 = vpack.c.bf16 %v530_v61, %v528_v60  ;;  %v548_v61 = vld [vmem:[%s1451_s3 + $0x3a0] sm:$0xff] }
  0xb8   : > { %898 = vmatprep.subr.bf16.mxu0 %v897_v10  ;;  %v534_v10 = vld [vmem:[%s1451_s3 + $0x330] sm:$0xff] }
  0xbb   : > { %900 = vmatpush1.bf16.msra.mxu0 %v899_v21 }
 0x17d   : > { %v291_v14 = vpop.f32.mrb[0].mxu0 }
 0x17e   : > { %v295_v15 = vmax.f32 %v291_v14, 0.0  ;;  %v811_v16 = vpop.f32.mrb[1].mxu0  ;;  %v833_v14 = vpack.c.bf16 %v451_v8, %v449_v7  ;;  %v917_v8 = vpack.c.bf16 %v535_v3, %v533_v2  ;;  %v487_v2 = vld [vmem:[%s1451_s3 + $0x1b8] sm:$0xff] }
 0x17f   : > { %v517_v16 = vld [vmem:[%s1451_s3 + $0x2a8] sm:$0xff] }
 0x180   : > { %813 = vmatpush3.msk.msra.mxu1 %vm301_vm4, %v295_v15  ;;  %v450_v15 = vld [vmem:[%s1451_s3 + $0x90] sm:$0xff] }
 0x181   : > { %815 = vmatmul.mubr.msk.f32.vlgmr.msra.gmra.mrb[0].mxu1 %vm297_vm5, %v296_v17  ;;  %818 = vmatprep.subr.bf16.mxu1 %v817_v29  ;;  %v519_v17 = vld [vmem:[%s1451_s3 + $0x2b8] sm:$0xff]  ;;  %v835_v22 = vpack.c.bf16 %v450_v15, %v448_v13  ;;  %v521_v29 = vld [vmem:[%s1451_s3 + $0x2c8] sm:$0xff]  ;;  %v470_v13 = vld [vmem:[%s1451_s3 + $0x130] sm:$0xff] }
 0x182   : > { %820 = vmatpush1.bf16.msra.mxu1 %v819_v33  ;;  %v901_v23 = vpack.c.bf16 %v519_v17, %v517_v16  ;;  %v903_v33 = vpack.c.bf16 %v518_v25, %v516_v24  ;;  %v905_v35 = vpack.c.bf16 %v523_v30, %v521_v29  ;;  %v539_v15 = vld [vmem:[%s1451_s3 + $0x358] sm:$0xff]  ;;  %v473_v16 = vld [vmem:[%s1451_s3 + $0x148] sm:$0xff]  ;;  %v472_v25 = vld [vmem:[%s1451_s3 + $0x140] sm:$0xff] }
 0x183   : > { %822 = vmatprep.subr.bf16.mxu1 %v821_v42  ;;  %v527_v42 = vld [vmem:[%s1451_s3 + $0x2f8] sm:$0xff]  ;;  %v859_v28 = vpack.c.bf16 %v474_v26, %v472_v25  ;;  %v493_v26 = vld [vmem:[%s1451_s3 + $0x1e8] sm:$0xff] }
 0x184   : > { %902 = vmatprep.subr.bf16.mxu0 %v901_v23  ;;  %v909_v47 = vpack.c.bf16 %v527_v42, %v525_v41  ;;  %v475_v17 = vld [vmem:[%s1451_s3 + $0x158] sm:$0xff]  ;;  %v538_v23 = vld [vmem:[%s1451_s3 + $0x350] sm:$0xff] }
 0x185   : > { %904 = vmatpush1.bf16.msra.mxu0 %v903_v33  ;;  %v857_v24 = vpack.c.bf16 %v475_v17, %v473_v16  ;;  %v479_v41 = vld [vmem:[%s1451_s3 + $0x178] sm:$0xff]  ;;  %v488_v16 = vld [vmem:[%s1451_s3 + $0x1c0] sm:$0xff]  ;;  %v490_v17 = vld [vmem:[%s1451_s3 + $0x1d0] sm:$0xff] }
 0x186   : > { %824 = vmatpush1.bf16.msra.mxu1 %v823_v46  ;;  %906 = vmatprep.subr.bf16.mxu0 %v905_v35  ;;  %v843_v46 = vpack.c.bf16 %v458_v40, %v456_v38  ;;  %v543_v35 = vld [vmem:[%s1451_s3 + $0x378] sm:$0xff]  ;;  %v477_v40 = vld [vmem:[%s1451_s3 + $0x168] sm:$0xff] }
 0x187   : > { %826 = vmatprep.subr.bf16.mxu1 %v825_v55  ;;  %v465_v55 = vld [vmem:[%s1451_s3 + $0x108] sm:$0xff]  ;;  %v861_v42 = vpack.c.bf16 %v479_v41, %v477_v40 }
 0x188   : > { %v849_v63 = vpack.c.bf16 %v467_v56, %v465_v55  ;;  %v480_v55 = vld [vmem:[%s1451_s3 + $0x180] sm:$0xff]  ;;  %v482_v56 = vld [vmem:[%s1451_s3 + $0x190] sm:$0xff] }
 0x189   : > { %908 = vmatpush1.bf16.msra.mxu0 %v907_v45  ;;  %v863_v45 = vpack.c.bf16 %v478_v44, %v476_v43 }
 0x18a   : > { %828 = vmatpush1.bf16.msra.mxu1 %v827_v59  ;;  %910 = vmatprep.subr.bf16.mxu0 %v909_v47  ;;  %v913_v59 = vpack.c.bf16 %v531_v54, %v529_v53  ;;  %v547_v47 = vld [vmem:[%s1451_s3 + $0x398] sm:$0xff] }
 0x18b   : > { %830 = vmatprep.subr.bf16.mxu1 %v829_v1  ;;  %v466_v1 = vld [vmem:[%s1451_s3 + $0x110] sm:$0xff]  ;;  %v483_v53 = vld [vmem:[%s1451_s3 + $0x198] sm:$0xff] }
 0x18c   : > { %v851_v7 = vpack.c.bf16 %v466_v1, %v464_v62  ;;  %v865_v54 = vpack.c.bf16 %v483_v53, %v481_v52  ;;  %v550_v62 = vld [vmem:[%s1451_s3 + $0x3b0] sm:$0xff]  ;;  %v485_v1 = vld [vmem:[%s1451_s3 + $0x1a8] sm:$0xff] }
 0x18d   : > { %912 = vmatpush1.bf16.msra.mxu0 %v911_v57  ;;  %v867_v57 = vpack.c.bf16 %v482_v56, %v480_v55  ;;  %v869_v3 = vpack.c.bf16 %v487_v2, %v485_v1 }
 0x18e   : > { %832 = vmatpush1.bf16.msra.mxu1 %v831_v9  ;;  %914 = vmatprep.subr.bf16.mxu0 %v913_v59  ;;  %v532_v9 = vld [vmem:[%s1451_s3 + $0x320] sm:$0xff]  ;;  %v551_v59 = vld [vmem:[%s1451_s3 + $0x3b8] sm:$0xff] }
 0x18f   : > { %834 = vmatprep.subr.bf16.mxu1 %v833_v14  ;;  %v537_v14 = vld [vmem:[%s1451_s3 + $0x348] sm:$0xff] }
 0x190   : > { %v921_v21 = vpack.c.bf16 %v539_v15, %v537_v14 }
 0x191   : > { %916 = vmatpush1.bf16.msra.mxu0 %v915_v6  ;;  %v871_v6 = vpack.c.bf16 %v486_v5, %v484_v4 }
 0x192   : > { %836 = vmatpush1.bf16.msra.mxu1 %v835_v22  ;;  %918 = vmatprep.subr.bf16.mxu0 %v917_v8  ;;  %v536_v22 = vld [vmem:[%s1451_s3 + $0x340] sm:$0xff]  ;;  %v555_v8 = vld [vmem:[%s1451_s3 + $0x3d8] sm:$0xff] }
 0x254   : > { %v1046_v18 = vpop.f32.mrb[0].mxu1 }
 0x255   : > { %376 = vrot.lane.b32.xlu1 %v1046_v18, %s985_s25  ;;  %v816_v19 = vpop.f32.mrb[1].mxu1 }
 0x256   : > { %v453_v19 = vld [vmem:[%s1451_s3 + $0xa8] sm:$0xff] }
 0x257   : > { %v837_v27 = vpack.c.bf16 %v455_v20, %v453_v19  ;;  %v919_v19 = vpack.c.bf16 %v534_v10, %v532_v9  ;;  %v855_v20 = vpack.c.bf16 %v470_v13, %v468_v11  ;;  %v552_v9 = vld [vmem:[%s1451_s3 + $0x3c0] sm:$0xff]  ;;  %v554_v11 = vld [vmem:[%s1451_s3 + $0x3d0] sm:$0xff]  ;;  %v491_v13 = vld [vmem:[%s1451_s3 + $0x1d8] sm:$0xff] }
 0x258   : > { %v939_v14 = vpack.c.bf16 %v554_v11, %v552_v9 }
 0x259   : > { %838 = vmatprep.subr.bf16.mxu1 %v837_v27  ;;  %920 = vmatpush1.bf16.msra.mxu0 %v919_v19  ;;  %v923_v27 = vpack.c.bf16 %v538_v23, %v536_v22  ;;  %v557_v19 = vld [vmem:[%s1451_s3 + $0x3e8] sm:$0xff]  ;;  %v556_v22 = vld [vmem:[%s1451_s3 + $0x3e0] sm:$0xff]  ;;  %v558_v23 = vld [vmem:[%s1451_s3 + $0x3f0] sm:$0xff] }
 0x25a   : > { %840 = vmatpush1.bf16.msra.mxu1 %v839_v34  ;;  %922 = vmatprep.subr.bf16.mxu0 %v921_v21  ;;  %v541_v34 = vld [vmem:[%s1451_s3 + $0x368] sm:$0xff]  ;;  %v559_v21 = vld [vmem:[%s1451_s3 + $0x3f8] sm:$0xff]  ;;  %v943_v25 = vpack.c.bf16 %v558_v23, %v556_v22 }
 0x25b   : > { %842 = vmatprep.subr.bf16.mxu1 %v841_v39  ;;  %v925_v36 = vpack.c.bf16 %v543_v35, %v541_v34  ;;  %v393_v34 = vlaneseq }
 0x25d   : > { %924 = vmatpush1.bf16.msra.mxu0 %v923_v27  ;;  %v495_v27 = vld [vmem:[%s1451_s3 + $0x1f8] sm:$0xff] }
 0x25e   : > { %844 = vmatpush1.bf16.msra.mxu1 %v843_v46  ;;  %926 = vmatprep.subr.bf16.mxu0 %v925_v36  ;;  %v545_v46 = vld [vmem:[%s1451_s3 + $0x388] sm:$0xff]  ;;  %v394_v36 = vshrl.u32 %v393_v34, 7 }
 0x25f   : > { %846 = vmatprep.subr.bf16.mxu1 %v845_v51  ;;  %v929_v48 = vpack.c.bf16 %v547_v47, %v545_v46  ;;  %v931_v51 = vpack.c.bf16 %v546_v50, %v544_v49 }
 0x262   : > { %848 = vmatpush1.bf16.msra.mxu1 %v847_v58  ;;  %v549_v58 = vld [vmem:[%s1451_s3 + $0x3a8] sm:$0xff] }
 0x263   : > { %850 = vmatprep.subr.bf16.mxu1 %v849_v63  ;;  %v933_v60 = vpack.c.bf16 %v551_v59, %v549_v58  ;;  %v935_v63 = vpack.c.bf16 %v550_v62, %v548_v61 }
 0x266   : > { %852 = vmatpush1.bf16.msra.mxu1 %v851_v7  ;;  %v553_v7 = vld [vmem:[%s1451_s3 + $0x3c8] sm:$0xff] }
 0x267   : > { %854 = vmatprep.subr.bf16.mxu1 %v853_v12  ;;  %v937_v10 = vpack.c.bf16 %v555_v8, %v553_v7  ;;  %v489_v12 = vld [vmem:[%s1451_s3 + $0x1c8] sm:$0xff] }
 0x268   : > { %v873_v15 = vpack.c.bf16 %v491_v13, %v489_v12 }
 0x26a   : > { %856 = vmatpush1.bf16.msra.mxu1 %v855_v20  ;;  %v875_v20 = vpack.c.bf16 %v490_v17, %v488_v16 }
 0x26b   : > { %858 = vmatprep.subr.bf16.mxu1 %v857_v24  ;;  %v941_v24 = vpack.c.bf16 %v559_v21, %v557_v19  ;;  %v716_v21 = vsub.s32 0, %v394_v36 }
 0x26e   : > { %860 = vmatpush1.bf16.msra.mxu1 %v859_v28  ;;  %v492_v28 = vld [vmem:[%s1451_s3 + $0x1e0] sm:$0xff] }
 0x26f   : > { %862 = vmatprep.subr.bf16.mxu1 %v861_v42 }
 0x272   : > { %864 = vmatpush1.bf16.msra.mxu1 %v863_v45 }
 0x273   : > { %866 = vmatprep.subr.bf16.mxu1 %v865_v54 }
 0x276   : > { %868 = vmatpush1.bf16.msra.mxu1 %v867_v57 }
 0x277   : > { %870 = vmatprep.subr.bf16.mxu1 %v869_v3 }
 0x27a   : > { %872 = vmatpush1.bf16.msra.mxu1 %v871_v6 }
 0x27b   : > { %874 = vmatprep.subr.bf16.mxu1 %v873_v15 }
 0x27e   : > { %876 = vmatpush1.bf16.msra.mxu1 %v875_v20 }
 0x2c7   : > { %v377_v29 = vpop.permute.xlu1 %376 }
 0x2c8   : > { %v379_v30 = vadd.f32 %v377_v29, %v1046_v18  ;;  %v542_v18 = vld [vmem:[%s1451_s3 + $0x370] sm:$0xff]  ;;  %v877_v29 = vpack.c.bf16 %v495_v27, %v493_v26 }
 0x2c9   : > { %v927_v39 = vpack.c.bf16 %v542_v18, %v540_v37 }
 0x2ca   : > { %v796_v31 = vmul.f32 -1.442695, %v379_v30  ;;  %v494_v30 = vld [vmem:[%s1451_s3 + $0x1f0] sm:$0xff]  ;;  %878 = vmatprep.subr.bf16.mxu1 %v877_v29 }
 0x2cb   : > { %928 = vmatpush1.bf16.msra.mxu0 %v927_v39 }
 0x2cc   : > { %963 = vpow2.f32 %v796_v31  ;;  %930 = vmatprep.subr.bf16.mxu0 %v929_v48  ;;  %v879_v31 = vpack.c.bf16 %v494_v30, %v492_v28 }
 0x2ce   : > { %880 = vmatpush1.bf16.msra.mxu1 %v879_v31 }
 0x2cf   : > { %932 = vmatpush1.bf16.msra.mxu0 %v931_v51 }
 0x2d0   : > { %934 = vmatprep.subr.bf16.mxu0 %v933_v60 }
 0x2d3   : > { %936 = vmatpush1.bf16.msra.mxu0 %v935_v63 }
 0x2d4   : > { %938 = vmatprep.subr.bf16.mxu0 %v937_v10 }
 0x2d6   : > { %v964_v32 = vpop.eup %963 }
 0x2d7   : > { %v383_v33 = vadd.f32 1.0, %v964_v32  ;;  %940 = vmatpush1.bf16.msra.mxu0 %v939_v14  ;;  %v987_v32 = vmov 839922192  }
 0x2d8   : > { %942 = vmatprep.subr.bf16.mxu0 %v941_v24 }
 0x2d9   : > { %965 = vrcp.f32 %v383_v33  ;;  %v391_v33 = vunpack.c.l.s4 %v987_v32 }
 0x2db   : > { %944 = vmatpush1.bf16.msra.mxu0 %v943_v25  ;;  %v392_v35 = vunpack.c.0.s8 %v391_v33 }
 0x2dd   : > { %v395_v37 = vsub.s32 %v392_v35, %v394_v36 }
 0x2e3   : > { %v966_v38 = vpop.eup %965 }
 0x2e4   : > { %388 = vperm.xlu1 %960, %v966_v38  }
 0x363   : > { %v389_v18 = vpop.permute.xlu1 %388 }
 0x364   : > { %v396_v38 = vrot.slane %v389_v18, %v395_v37 }
 0x366   : > { %v398_v39 = vmul.f32 %v396_v38, %v1029_v0 }
 0x368   : > { %v400_v40 = vcombine.high %v398_v39, %v398_v39  ;;  %v402_v41 = vsel %vm202_vm0, %v398_v39, 0.0  ;;  %v416_v42 = vsel %vm202_vm0, %v398_v39, -inf }
 0x369   : > { %v403_v43 = vrot.slane %v402_v41, 4  ;;  %v417_v44 = vrot.slane %v416_v42, 4 }
 0x36a   : > { %v409_v45 = vsel %vm202_vm0, %v400_v40, 0.0  ;;  %v423_v46 = vsel %vm202_vm0, %v400_v40, -inf }
 0x36b   : > { %v404_v47 = vadd.f32 %v403_v43, %v402_v41  ;;  %v410_v48 = vrot.slane %v409_v45, 4  ;;  %v418_v49 = vmax.f32 %v416_v42, %v417_v44  ;;  %v424_v50 = vrot.slane %v423_v46, 4 }
 0x36d   : > { %v405_v51 = vrot.slane %v404_v47, 2  ;;  %v419_v52 = vrot.slane %v418_v49, 2  ;;  %v425_v53 = vmax.f32 %v423_v46, %v424_v50  ;;  %v411_v54 = vadd.f32 %v410_v48, %v409_v45 }
 0x36f   : > { %v426_v55 = vrot.slane %v425_v53, 2  ;;  %v420_v56 = vmax.f32 %v418_v49, %v419_v52  ;;  %v412_v57 = vrot.slane %v411_v54, 2  ;;  %v406_v58 = vadd.f32 %v405_v51, %v404_v47 }
 0x371   : > { %v427_v59 = vmax.f32 %v425_v53, %v426_v55  ;;  %v413_v60 = vadd.f32 %v412_v57, %v411_v54  ;;  %v407_v61 = vrot.slane %v406_v58, 1  ;;  %v421_v62 = vrot.slane %v420_v56, 1 }
 0x373   : > { %v428_v63 = vrot.slane %v427_v59, 1  ;;  %v414_v1 = vrot.slane %v413_v60, 1  ;;  %v408_v2 = vadd.f32 %v407_v61, %v406_v58  ;;  %v422_v5 = vmax.f32 %v420_v56, %v421_v62 }
 0x375   : > { %v429_v3 = vmax.f32 %v427_v59, %v428_v63  ;;  %v415_v4 = vadd.f32 %v414_v1, %v413_v60  ;;  %v430_v7 = vmul.f32 0.25, %v408_v2 }
 0x377   : > { %695 = vmatprep.mubr.f32.mxu0 %v429_v3  ;;  %v431_v6 = vmul.f32 0.25, %v415_v4 }
 0x378   : > { %696 = vmatmul.mubr.f32.vlgmr.msra.gmra.mrb[2].mxu0 %v422_v5 }
 0x379   : > { %624 = vmatprep.mubr.f32.mxu1 %v431_v6 }
 0x37a   : > { %625 = vmatmul.mubr.f32.vlgmr.msra.gmra.mrb[2].mxu1 %v430_v7 }
 0x44b   : > { %v697_v8 = vpop.f32.mrb[2].mxu0 }
 0x44c   : > { %v699_v9 = vpop.f32.mrb[3].mxu0 }
 0x44d   : > { %v626_v10 = vpop.f32.mrb[2].mxu1 }
 0x44e   : > { %v698_v11 = vadd.f32 %v697_v8, %v626_v10  ;;  %v628_v12 = vpop.f32.mrb[3].mxu1 }
 0x44f   : > { %v700_v13 = vadd.f32 %v699_v9, %v628_v12 }
 0x450   : > { %v797_v14 = vmul.f32 -1.442695, %v698_v11 }
 0x451   : > { %v798_v15 = vmul.f32 -1.442695, %v700_v13 }
 0x452   : > { %967 = vpow2.f32 %v797_v14 }
 0x453   : > { %969 = vpow2.f32 %v798_v15 }
 0x45c   : > { %v968_v16 = vpop.eup %967 }
 0x45d   : > { %v970_v17 = vpop.eup %969  ;;  %v708_v19 = vadd.f32 1.0, %v968_v16 }
 0x45e   : > { %v709_v20 = vadd.f32 1.0, %v970_v17 }
 0x45f   : > { %971 = vrcp.f32 %v708_v19 }
 0x460   : > { %973 = vrcp.f32 %v709_v20 }
 0x469   : > { %v972_v22 = vpop.eup %971 }
 0x46a   : > { %v974_v23 = vpop.eup %973  ;;  %v717_v24 = vrot.slane %v972_v22, %v716_v21 }
 0x46b   : > { %v721_v25 = vrot.slane %v974_v23, %v716_v21 }
 0x46d   : > { %v724_v26 = vcombine.low %v717_v24, %v721_v25 }
 0x46f   : > { %v726_v27 = vmul.f32 %v724_v26, %v1029_v0 }
 0x471   : > { %727 = vst [vmem:[%s197_s5] sm:$0xff] %v726_v27 }
 0x472 PF: > { %s14_s15 = sadd.s32 1, %s981_s15  }
 0x473   : > { %p11_p4 = scmp.ge.s32.totalorder %s14_s15, 4  }
 0x475   :  { %13 = sbr.rel (!%p11_p4) target bundleno = 1 (0x1), region = 66 }

</bundles_post_ra>
